<compile_context>
chip_gen: v7x
topology: tpu7x:2x2x1
jax: 0.10.0
libtpu: 0.0.40
codegen_flags: <defaults>
</compile_context>

<pallas_src>
import jax
import jax.numpy as jnp
from jax.experimental import pallas as pl
from jax.experimental.pallas import tpu as pltpu


def _outconv_kernel(x_ref, y4_ref, ws_ref, bs_ref, w_ref, b_ref, out_ref):
    # x_ref:   (Bn, 3,   TP)  input pixels (channels on sublanes, pixels on lanes)
    # y4_ref:  (Bn, Cin, TP)  skip-added feature map
    # ws_ref:  (Cin, 3)       1x1 conv_skip weight
    # bs_ref:  (Cin, 1)       conv_skip bias
    # w_ref:   (Cout, Cin)    1x1 conv weight
    # b_ref:   (Cout, 1)      conv bias
    # out_ref: (Bn, Cout, TP) lane-dense output block
    ws = ws_ref[...]
    bs = bs_ref[...]
    w = w_ref[...]
    b = b_ref[...]
    # Static unroll over the (small) batch block; each iteration is two plain
    # 2-D MXU matmuls on a lane-dense (C, TP) tile.
    for i in range(x_ref.shape[0]):
        x = x_ref[i]                                   # (3, TP)
        y4 = y4_ref[i]                                 # (Cin, TP)
        # out1 = conv_skip(x); out3 = relu(out1 + y4)
        h = jnp.dot(ws, x, preferred_element_type=jnp.float32) + bs
        h = jnp.maximum(h + y4, 0.0)                   # (Cin, TP)
        # out4 = conv(out3); Icp = sigmoid(out4)
        o = jnp.dot(w, h, preferred_element_type=jnp.float32) + b
        out_ref[i] = (1.0 / (1.0 + jnp.exp(-o))).astype(out_ref.dtype)


def _tile_params(N, HW, Cx, Cin, Cout, itemsize=4):
    """Pick (batch block Bn, pixel tile TP, grid) from HBM/VMEM budgets."""
    pad8 = lambda c: ((c + 7) // 8) * 8
    hbm_px = (Cx + Cin + Cout) * itemsize                      # HBM bytes per pixel
    vmem_px = (pad8(Cx) + pad8(Cin) + pad8(Cout)) * itemsize   # VMEM bytes per pixel (sublane-padded)

    TARGET_STEP_BYTES = 4 << 20   # >= ~4 MiB HBM traffic/step: amortizes the ~0.35us
                                  # per-step cost even at v7x's ~3.2 TB/s
    VMEM_STEP_BYTES = 8 << 20     # single-buffer block budget; x2 buffering + f32
                                  # intermediates stays well under the scoped limit

    px_budget = min(TARGET_STEP_BYTES // hbm_px, VMEM_STEP_BYTES // vmem_px)
    px_budget = max(px_budget, 128)

    if HW >= px_budget:
        # Large images: tile the pixel axis with a lane-dense multiple of 128
        # (cdiv grid; the last block is masked if TP does not divide HW).
        bn = 1
        tp = max((px_budget // 128) * 128, 128)
    else:
        # Small images: full pixel extent; block several batch elements per
        # step so each step still moves useful HBM traffic (cap the unroll).
        tp = HW
        bn = max(min(px_budget // max(HW, 1), N, 8), 1)
        if bn >= N and N > 1:
            bn = (N + 1) // 2   # keep >=2 grid steps so v7x's two TCs both get work

    if N == 1 and pl.cdiv(HW, tp) < 2 and HW >= 256:
        # A single-step grid leaves one v7x TensorCore idle and disables
        # pipelining: split the pixel axis into >=2 128-aligned blocks.
        tp = max(pl.cdiv(pl.cdiv(HW, 2), 128) * 128, 128)

    grid = (pl.cdiv(N, bn), pl.cdiv(HW, tp))
    return bn, tp, grid


def outconv_forward(y4, x, params):
    """y4: (N, Cin, H, W) f32, x: (N, 3, H, W) f32 -> (N, Cout, H, W) f32."""
    w_skip, b_skip, w, b = params
    N, Cin, H, W = y4.shape
    _, Cx, _, _ = x.shape
    Cout = w.shape[0]
    HW = H * W

    x2 = x.reshape(N, Cx, HW)          # free reshape (contiguous NCHW)
    y42 = y4.reshape(N, Cin, HW)
    bs_2d = b_skip.reshape(Cin, 1)
    b_2d = b.reshape(Cout, 1)

    bn, tp, grid = _tile_params(N, HW, Cx, Cin, Cout)

    cost = pl.CostEstimate(
        flops=2 * (Cx * Cin + Cin * Cout) * N * HW,
        transcendentals=Cout * N * HW,
        bytes_accessed=(Cx + Cin + Cout) * N * HW * 4
        + (Cin * Cx + Cin + Cout * Cin + Cout) * 4,
    )

    out = pl.pallas_call(
        _outconv_kernel,
        out_shape=jax.ShapeDtypeStruct((N, Cout, HW), jnp.float32),
        grid_spec=pltpu.PrefetchScalarGridSpec(
            num_scalar_prefetch=0,
            grid=grid,
            in_specs=[
                pl.BlockSpec((bn, Cx, tp), lambda n, p: (n, 0, p)),
                pl.BlockSpec((bn, Cin, tp), lambda n, p: (n, 0, p)),
                pl.BlockSpec((Cin, Cx), lambda n, p: (0, 0)),
                pl.BlockSpec((Cin, 1), lambda n, p: (0, 0)),
                pl.BlockSpec((Cout, Cin), lambda n, p: (0, 0)),
                pl.BlockSpec((Cout, 1), lambda n, p: (0, 0)),
            ],
            out_specs=pl.BlockSpec((bn, Cout, tp), lambda n, p: (n, 0, p)),
        ),
        compiler_params=pltpu.CompilerParams(
            dimension_semantics=("parallel", "parallel"),
            vmem_limit_bytes=48 << 20),
        cost_estimate=cost,
    )(x2, y42, w_skip, bs_2d, w, b_2d)

    return out.reshape(N, Cout, H, W)  # free reshape


def reference(y4, x, params):
    """Pure-JAX reference of the same forward pass (NCHW in/out)."""
    w_skip, b_skip, w, b = params
    out1 = jnp.einsum('nihw,oi->nohw', x, w_skip) + b_skip[None, :, None, None]
    out3 = jnp.maximum(out1 + y4, 0.0)
    out4 = jnp.einsum('nihw,oi->nohw', out3, w) + b[None, :, None, None]
    return jax.nn.sigmoid(out4)


def init_params(key, in_channels, out_channels):
    ks = jax.random.split(key, 4)
    # 1x1 conv weights stored as (out_c, in_c) (PyTorch OIHW with the 1x1
    # spatial dims squeezed away).
    w_skip = jax.random.normal(ks[0], (in_channels, 3), jnp.float32) * 0.3
    b_skip = jax.random.normal(ks[1], (in_channels,), jnp.float32) * 0.3
    w = jax.random.normal(ks[2], (out_channels, in_channels), jnp.float32) * 0.3
    b = jax.random.normal(ks[3], (out_channels,), jnp.float32) * 0.3
    return (w_skip, b_skip, w, b)


if __name__ == "__main__":
    key = jax.random.PRNGKey(0)
    k_x, k_y, k_p, k_x2, k_y2 = jax.random.split(key, 5)

    N, Cin, Cout, H, W = 2, 4, 8, 16, 16
    x = jax.random.normal(k_x, (N, 3, H, W), jnp.float32)     # RGB input to conv_skip
    y4 = jax.random.normal(k_y, (N, Cin, H, W), jnp.float32)  # feature map added to out1
    params = init_params(k_p, Cin, Cout)

    out = jax.block_until_ready(outconv_forward(y4, x, params))
    ref = jax.block_until_ready(reference(y4, x, params))
    assert out.shape == (N, Cout, H, W), out.shape
    assert jnp.allclose(out, ref, atol=1e-5, rtol=1e-5), float(jnp.max(jnp.abs(out - ref)))

    # Second check: odd batch (ragged/masked last batch block) and a spatial
    # size that is not a multiple of 128.
    N2, H2, W2 = 3, 20, 12
    xb = jax.random.normal(k_x2, (N2, 3, H2, W2), jnp.float32)
    y4b = jax.random.normal(k_y2, (N2, Cin, H2, W2), jnp.float32)
    outb = jax.block_until_ready(outconv_forward(y4b, xb, params))
    refb = jax.block_until_ready(reference(y4b, xb, params))
    assert outb.shape == (N2, Cout, H2, W2), outb.shape
    assert jnp.allclose(outb, refb, atol=1e-5, rtol=1e-5), float(jnp.max(jnp.abs(outb - refb)))

    print("KERNEL_OK")
</pallas_src>

<mosaic_0001>
module attributes {stable_mosaic.version = 11 : i64} {
  func.func @_outconv_kernel(%arg0: i32, %arg1: i32, %arg2: memref<1x3x256xf32, #tpu.memory_space<vmem>>, %arg3: memref<1x4x256xf32, #tpu.memory_space<vmem>>, %arg4: memref<4x3xf32, #tpu.memory_space<vmem>>, %arg5: memref<4x1xf32, #tpu.memory_space<vmem>>, %arg6: memref<8x4xf32, #tpu.memory_space<vmem>>, %arg7: memref<8x1xf32, #tpu.memory_space<vmem>>, %arg8: memref<1x8x256xf32, #tpu.memory_space<vmem>>) attributes {dimension_semantics = [#tpu.dimension_semantics<parallel>, #tpu.dimension_semantics<parallel>], iteration_bounds = array<i64: 2, 1>, scalar_prefetch = 0 : i64, scratch_operands = 0 : i64, tpu.core_type = #tpu.core_type<tc>, window_params = [{transform_indices = @transform_0, window_bounds = array<i64: 1, 3, 256>}, {transform_indices = @transform_1, window_bounds = array<i64: 1, 4, 256>}, {pipeline_mode = #tpu.pipeline_mode<synchronous>, transform_indices = @transform_2, window_bounds = array<i64: 4, 3>}, {pipeline_mode = #tpu.pipeline_mode<synchronous>, transform_indices = @transform_3, window_bounds = array<i64: 4, 1>}, {pipeline_mode = #tpu.pipeline_mode<synchronous>, transform_indices = @transform_4, window_bounds = array<i64: 8, 4>}, {pipeline_mode = #tpu.pipeline_mode<synchronous>, transform_indices = @transform_5, window_bounds = array<i64: 8, 1>}, {transform_indices = @transform_6, window_bounds = array<i64: 1, 8, 256>}]} {
    %c0 = arith.constant 0 : index
    %c0_0 = arith.constant 0 : index
    %0 = vector.load %arg4[%c0, %c0_0] : memref<4x3xf32, #tpu.memory_space<vmem>>, vector<4x3xf32>
    %c0_1 = arith.constant 0 : index
    %c0_2 = arith.constant 0 : index
    %1 = vector.load %arg5[%c0_1, %c0_2] : memref<4x1xf32, #tpu.memory_space<vmem>>, vector<4x1xf32>
    %c0_3 = arith.constant 0 : index
    %c0_4 = arith.constant 0 : index
    %2 = vector.load %arg6[%c0_3, %c0_4] : memref<8x4xf32, #tpu.memory_space<vmem>>, vector<8x4xf32>
    %c0_5 = arith.constant 0 : index
    %c0_6 = arith.constant 0 : index
    %3 = vector.load %arg7[%c0_5, %c0_6] : memref<8x1xf32, #tpu.memory_space<vmem>>, vector<8x1xf32>
    %c0_7 = arith.constant 0 : index
    %c0_8 = arith.constant 0 : index
    %c0_9 = arith.constant 0 : index
    %4 = vector.load %arg2[%c0_7, %c0_8, %c0_9] : memref<1x3x256xf32, #tpu.memory_space<vmem>>, vector<1x3x256xf32>
    %5 = vector.shape_cast %4 : vector<1x3x256xf32> to vector<3x256xf32>
    %c0_10 = arith.constant 0 : index
    %c0_11 = arith.constant 0 : index
    %c0_12 = arith.constant 0 : index
    %6 = vector.load %arg3[%c0_10, %c0_11, %c0_12] : memref<1x4x256xf32, #tpu.memory_space<vmem>>, vector<1x4x256xf32>
    %7 = vector.shape_cast %6 : vector<1x4x256xf32> to vector<4x256xf32>
    %cst = arith.constant dense<0.000000e+00> : vector<4x256xf32>
    %8 = tpu.matmul %0, %5, %cst {dimension_numbers = #tpu.dot_dimension_numbers<[1], [0], [0], [1], [0, 0, 1, 1], [], []>} : vector<4x3xf32>, vector<3x256xf32>, vector<4x256xf32> -> vector<4x256xf32>
    %9 = vector.broadcast %1 : vector<4x1xf32> to vector<4x256xf32>
    %10 = arith.addf %8, %9 : vector<4x256xf32>
    %11 = arith.addf %10, %7 : vector<4x256xf32>
    %cst_13 = arith.constant 0.000000e+00 : f32
    %12 = vector.broadcast %cst_13 : f32 to vector<4x256xf32>
    %13 = arith.maximumf %11, %12 : vector<4x256xf32>
    %cst_14 = arith.constant dense<0.000000e+00> : vector<8x256xf32>
    %14 = tpu.matmul %2, %13, %cst_14 {dimension_numbers = #tpu.dot_dimension_numbers<[1], [0], [0], [1], [0, 0, 1, 1], [], []>} : vector<8x4xf32>, vector<4x256xf32>, vector<8x256xf32> -> vector<8x256xf32>
    %15 = vector.broadcast %3 : vector<8x1xf32> to vector<8x256xf32>
    %16 = arith.addf %14, %15 : vector<8x256xf32>
    %cst_15 = arith.constant 0.000000e+00 : f32
    %17 = vector.broadcast %cst_15 : f32 to vector<8x256xf32>
    %18 = arith.subf %17, %16 : vector<8x256xf32>
    %19 = math.exp %18 : vector<8x256xf32>
    %cst_16 = arith.constant 1.000000e+00 : f32
    %20 = vector.broadcast %cst_16 : f32 to vector<8x256xf32>
    %21 = arith.addf %20, %19 : vector<8x256xf32>
    %cst_17 = arith.constant 1.000000e+00 : f32
    %22 = vector.broadcast %cst_17 : f32 to vector<8x256xf32>
    %23 = arith.divf %22, %21 : vector<8x256xf32>
    %c0_18 = arith.constant 0 : index
    %c0_19 = arith.constant 0 : index
    %c0_20 = arith.constant 0 : index
    %24 = vector.load %arg8[%c0_18, %c0_19, %c0_20] : memref<1x8x256xf32, #tpu.memory_space<vmem>>, vector<1x8x256xf32>
    %25 = vector.shape_cast %24 : vector<1x8x256xf32> to vector<8x256xf32>
    %26 = vector.shape_cast %23 : vector<8x256xf32> to vector<1x8x256xf32>
    tpu.vector_store %arg8[%c0_18, %c0_19, %c0_20], %26 {strides = array<i32>} : memref<1x8x256xf32, #tpu.memory_space<vmem>>, vector<1x8x256xf32>,
    return
  }
  func.func @transform_0(%arg0: i32, %arg1: i32) -> (i32, i32, i32) {
    %c0_i32 = arith.constant 0 : i32
    %c0_i32_0 = arith.constant 0 : i32
    return %arg0, %c0_i32, %arg1 : i32, i32, i32
  }
  func.func @transform_1(%arg0: i32, %arg1: i32) -> (i32, i32, i32) {
    %c0_i32 = arith.constant 0 : i32
    %c0_i32_0 = arith.constant 0 : i32
    return %arg0, %c0_i32, %arg1 : i32, i32, i32
  }
  func.func @transform_2(%arg0: i32, %arg1: i32) -> (i32, i32) {
    %c0_i32 = arith.constant 0 : i32
    %c0_i32_0 = arith.constant 0 : i32
    %c0_i32_1 = arith.constant 0 : i32
    return %c0_i32, %c0_i32_0 : i32, i32
  }
  func.func @transform_3(%arg0: i32, %arg1: i32) -> (i32, i32) {
    %c0_i32 = arith.constant 0 : i32
    %c0_i32_0 = arith.constant 0 : i32
    %c0_i32_1 = arith.constant 0 : i32
    return %c0_i32, %c0_i32_0 : i32, i32
  }
  func.func @transform_4(%arg0: i32, %arg1: i32) -> (i32, i32) {
    %c0_i32 = arith.constant 0 : i32
    %c0_i32_0 = arith.constant 0 : i32
    %c0_i32_1 = arith.constant 0 : i32
    return %c0_i32, %c0_i32_0 : i32, i32
  }
  func.func @transform_5(%arg0: i32, %arg1: i32) -> (i32, i32) {
    %c0_i32 = arith.constant 0 : i32
    %c0_i32_0 = arith.constant 0 : i32
    %c0_i32_1 = arith.constant 0 : i32
    return %c0_i32, %c0_i32_0 : i32, i32
  }
  func.func @transform_6(%arg0: i32, %arg1: i32) -> (i32, i32, i32) {
    %c0_i32 = arith.constant 0 : i32
    %c0_i32_0 = arith.constant 0 : i32
    return %arg0, %c0_i32, %arg1 : i32, i32, i32
  }
}

</mosaic_0001>

<bundles_post_ra>
// kernel: tpu_custom_call.1
= control target key start
LH: loop header
LB: loop body
LE: loop exit
PB: predicated region body
PF: predicated region fallthrough
CT: control target
= control target key end

     0   :  { %11 = vsyncpa [#allocation3], 0  ;;  %s966_s0 = inlined_call_operand.vmem [shape: f32[2,3,256], index: 0, kind: input, shape index: {}]   ;;  %s967_s1 = inlined_call_operand.vmem [shape: f32[2,4,256], index: 1, kind: input, shape index: {}]   ;;  %s968_s2 = inlined_call_operand.vmem [shape: f32[4,3], index: 2, kind: input, shape index: {}]   ;;  %s969_s3 = inlined_call_operand.vmem [shape: f32[4,1], index: 3, kind: input, shape index: {}]   ;;  %s970_s4 = inlined_call_operand.vmem [shape: f32[8,4], index: 4, kind: input, shape index: {}]   ;;  %s971_s5 = inlined_call_operand.vmem [shape: f32[8,1], index: 5, kind: input, shape index: {}]   ;;  %s972_s6 = inlined_call_operand.hbm [shape: f32[2,8,256], index: 6, kind: output, shape index: {}]  }
   0x1   :  { %13 = vsyncpa [#allocation3 + $0x1], 0  ;;  %s839_s21 = smov 0   ;;  %s841_s22 = smov 0  }
   0x2   :  { %s843_s23 = smov 0   ;;  %s845_s24 = smov 0  }
   0x3   :  { %s847_s25 = smov 0   ;;  %s849_s26 = smov 0  }
   0x4 LB: > { %s629_s27 = sadd.s32 4294967295, %s799_s26   ;;  %s630_s28 = sadd.s32 4294967294, %s799_s26   ;;  %s799_s26 = sphi %s849_s26, %s19_s26   ;;  %s795_s25 = sphi %s847_s25, %s979_s25   ;;  %s791_s24 = sphi %s845_s24, %s978_s24   ;;  %s787_s23 = sphi %s843_s23, %s977_s23   ;;  %s783_s22 = sphi %s841_s22, %s976_s22   ;;  %s779_s21 = sphi %s839_s21, %s975_s21  }
   0x5   : > { %s31_s29 = sadd.s32 1, %s795_s25  ;;  %s180_s30 = sadd.s32 1, %s787_s23 }
   0x6   : > { %p33_p0 = scmp.ge.s32.totalorder %s31_s29, 2  ;;  %p190_p1 = scmp.ne.s32.totalorder %s787_s23, %s783_s22 }
   0x7   : > { %p191_p2 = scmp.eq.s32.totalorder %s629_s27, 1  ;;  %p196_p3 = scmp.ne.s32.totalorder %s783_s22, %s779_s21 }
   0x8   : > { %s981_s29 = smov (%p33_p0, %s31_s29), 0  ;;  %p197_p5 = scmp.eq.s32.totalorder %s630_s28, 1 }
   0x9   : > { %p879_p4 = por %p191_p2, %p190_p1  ;;  %s175_s8 = ssub.s32 %s795_s25, %s981_s29 }
   0xa   : > { %p633_p6 = scmp.ge.s32.totalorder %s799_s26, 1  ;;  %p178_p7 = scmp.eq.s32.totalorder %s175_s8, 0 }
   0xb   : > { %p886_p8 = por %p197_p5, %p196_p3  ;;  %p253_p9 = scmp.lt.s32.totalorder %s799_s26, 3 }
   0xc   : > { %s892_s10 = scalar_select %p178_p7, %s787_s23, %s180_s30  }
   0xd   : > { %p254_p10 = pnand %p633_p6, %p253_p9 }
   0xe   : > { %p297_p11 = scmp.lt.s32.totalorder (!%p254_p10), %s791_s24, 1  ;;  %v801_v0 = vmov (!%p254_p10), 0.0   ;;  %v318_v1 = vld [vmem:[%s969_s3] sm:$0xf] (!%p254_p10)  ;;  %v802_v2 = vmov (!%p254_p10), 0   ;;  %vm334_vm0 = vcmask (!%p254_p10), 1042432  }
   0xf   : > { %257 = sbr.rel (%p254_p10) target bundleno = 509 (0x1fd), region = 44  ;;  %403 = vmatprep.mubr.f32.mxu0 (!%p254_p10), %v801_v0  ;;  %497 = vmatprep.mubr.f32.mxu1 (!%p254_p10), %v801_v0  ;;  %v320_v3 = vld [vmem:[%s971_s5] sm:$0xff] (!%p254_p10)  ;;  %vm330_vm1 = vcmask (!%p254_p10), 23552   ;;  %vm426_vm2 = vcmask (!%p254_p10), 1043456   ;;  %vm422_vm3 = vcmask (!%p254_p10), 31744   ;;  %s652_s15 = sshll.u32 (!%p254_p10), %s791_s24, 8 }
  0x10   : > { %710 = vset.pattern.permute.xlu0 (!%p254_p10), %v802_v2  ;;  %v317_v6 = vld [vmem:[%s968_s2] sm:$0xf] (!%p254_p10)  ;;  %s919_s20 = scalar_lea.hbm (!%p254_p10), %s972_s6, %s652_s15 }
  0x11   : > { %325 = vperm.xlu0 (!%p254_p10), %710, %v318_v1   ;;  %v319_v18 = vld [vmem:[%s970_s4] sm:$0xff] (!%p254_p10) }
  0x15   : > { %419 = vperm.xlu0 (!%p254_p10), %710, %v320_v3  }
  0x16   : > { %s298_s13 = scalar_select %p297_p11, %s791_s24, 1 }
  0x17   : > { %s803_s24 = smov [#allocation2]  }
  0x18   : > { %s650_s14 = sshll.u32 %s298_s13, 3  ;;  %s293_s13 = sand.u32 1, %s783_s22  }
  0x19   : > { %s304_s19 = scalar_lea.vmem %s966_s0, %s650_s14  ;;  %s314_s8 = scalar_lea.vmem %s967_s1, %s650_s14 }
  0x1a   : > { %v321_v4 = vld [vmem:[%s304_s19] sm:$0x77]  ;;  %s634_s14 = sshll.u32 %s293_s13, 4  ;;  %s519_s27 = scalar_lea.sflag [#allocation3], %s293_s13 }
  0x1b   : > { %v329_v5 = vcombine.high %v321_v4, %v321_v4  ;;  %v322_v7 = vld [vmem:[%s314_s8] sm:$0xff]  ;;  %s295_s16 = scalar_lea.vmem [#allocation2], %s634_s14  ;;  %s725_s30 = sshll.u32 %s803_s24, 4  ;;  %s726_s30 = int_to_ptr.vmem [resolvable:$false] %s725_s30 }
  0x1c   : > { %v411_v10 = vcombine.high %v322_v7, %v322_v7  ;;  %s535_s17 = sshll.u32 %s295_s16, 4  ;;  %s727_s8 = scalar_lea.vmem %s726_s30, 512  ;;  %s921_s17 = int_to_ptr.vmem [resolvable:$true] %s535_s17 }
  0x1d   : > { %639 = vmatprep.subr.msk.mxu0 %vm334_vm0, %v329_v5  ;;  %s721_s28 = scalar_lea.vmem %s921_s17, 256  ;;  %p728_p1 = scmp.lt.s32.totalorder %s921_s17, %s726_s30 }
  0x1e   : > { %640 = vmatpush1.msk.msra.mxu0 %vm334_vm0, %v321_v4  ;;  %p722_p12 = scmp.ne.s32.totalorder %s921_s17, %s721_s28  ;;  %p729_p2 = scmp.lt.s32.totalorder %s727_s8, %s721_s28 }
  0x1f   : > { %641 = vmatmul.mubr.msk.f32.vlgmr.msra.gmra.mrb[0].mxu0 %vm330_vm1, %v317_v6 }
  0x20   : > { %p723_p13 = pnand %p722_p12, %p879_p4  ;;  %p730_p3 = por %p729_p2, %p728_p1 }
  0x22   : > { %p724_p0 = pneg %p723_p13 }
  0x24   : > { %p731_p5 = pnand %p730_p3, %p724_p0 }
  0x90   : > { %v326_v8 = vpop.permute.xlu0 %325 }
  0x94   : > { %v420_v19 = vpop.permute.xlu0 %419 }
  0xf2   : > { %v405_v9 = vpop.f32.mrb[0].mxu0 }
  0xf3   : > { %v406_v11 = vadd.f32 %v405_v9, %v326_v8  ;;  %v407_v12 = vpop.f32.mrb[1].mxu0 }
  0xf4   : > { %v408_v13 = vadd.f32 %v407_v12, %v326_v8 }
  0xf5   : > { %v413_v14 = vadd.f32 %v406_v11, %v322_v7 }
  0xf6   : > { %v414_v15 = vadd.f32 %v411_v10, %v408_v13 }
  0xf7   : > { %v415_v17 = vmax.f32 %v413_v14, 0.0 }
  0xf8   : > { %v416_v16 = vmax.f32 %v414_v15, 0.0 }
  0xfa   : > { %642 = vmatprep.subr.msk.mxu1 %vm426_vm2, %v416_v16 }
  0xfb   : > { %643 = vmatpush1.msk.msra.mxu1 %vm426_vm2, %v415_v17 }
  0xfc   : > { %644 = vmatmul.mubr.msk.f32.vlgmr.msra.gmra.mrb[0].mxu1 %vm422_vm3, %v319_v18 }
 0x1cf   : > { %v499_v20 = vpop.f32.mrb[0].mxu1 }
 0x1d0   : > { %v500_v21 = vadd.f32 %v499_v20, %v420_v19  ;;  %v501_v22 = vpop.f32.mrb[1].mxu1 }
 0x1d1   : > { %v502_v23 = vadd.f32 %v501_v22, %v420_v19 }
 0x1d2   : > { %v504_v24 = vsub.f32 0.0, %v500_v21 }
 0x1d3   : > { %v505_v25 = vsub.f32 0.0, %v502_v23 }
 0x1d4   : > { %v506_v26 = vmul.f32 1.442695, %v504_v24 }
 0x1d5   : > { %v508_v27 = vmul.f32 1.442695, %v505_v25 }
 0x1d6   : > { %713 = vpow2.f32 %v506_v26 }
 0x1d7   : > { %715 = vpow2.f32 %v508_v27 }
 0x1e0   : > { %v714_v28 = vpop.eup %713 }
 0x1e1   : > { %v716_v29 = vpop.eup %715  ;;  %v510_v30 = vadd.f32 1.0, %v714_v28 }
 0x1e2   : > { %v511_v31 = vadd.f32 1.0, %v716_v29 }
 0x1e3   : > { %717 = vrcp.f32 %v510_v30 }
 0x1e4   : > { %719 = vrcp.f32 %v511_v31 }
 0x1ed   : > { %v718_v32 = vpop.eup %717 }
 0x1ee   : > { %v720_v33 = vpop.eup %719  ;;  %516 = vst [vmem:[%s295_s16] sm:$0xff] %v718_v32 }
 0x1ef   : > { %517 = vst [vmem:[%s295_s16 + $0x8] sm:$0xff] %v720_v33 }
 0x1f0   : > { %734 = shalt.err (!%p731_p5)
}
 0x1f1   : > { %s735_s11 = scalar_lea.hbm %s919_s20, 256  ;;  %s739_s14 = scalar_lea.hbm %s972_s6, 512 }
 0x1f2   : > { %p736_p6 = scmp.ne.s32.totalorder %s919_s20, %s735_s11  ;;  %p740_p10 = scmp.lt.u32.totalorder %s919_s20, %s972_s6 }
 0x1f3   : > { %p741_p11 = scmp.lt.u32.totalorder %s739_s14, %s735_s11  ;;  %p743_p13 = scmp.lt.u32.totalorder %s735_s11, %s919_s20 }
 0x1f4   : > { %p737_p7 = pnand %p736_p6, %p879_p4 }
 0x1f5   : > { %p742_p12 = por %p741_p11, %p740_p10 }
 0x1f6   : > { %p738_p9 = pneg %p737_p7 }
 0x1f7   : > { %p744_p0 = por %p743_p13, %p742_p12 }
 0x1f9   : > { %p745_p1 = pnand %p744_p0, %p738_p9 }
 0x1fb   : > { %748 = shalt.err (!%p745_p1)
}
 0x1fc   : > { %653 = dma.vmem_to_hbm [thread:$0]  (%p879_p4), %s921_s17, 256, %s919_s20, %s519_s27  }
 0x1fd PF: > { %p659_p2 = scmp.ge.s32.totalorder %s799_s26, 2  ;;  %s547_s18 = sand.u32 1, %s779_s21  }
 0x1fe   : > { %s548_s19 = scalar_lea.sflag [#allocation3], %s547_s18 }
 0x1ff   : > { %p656_p3 = pnand %p659_p2, %p886_p8 }
 0x201   : > { %774 = dma.done.wait (!%p656_p3), %s548_s19, 256  }
 0x202   : > { %776 = vsyncadd (!%p656_p3), %s548_s19, 4294967040  ;;  %s19_s26 = sadd.s32 1, %s799_s26   ;;  %s975_s21 = smov %s783_s22 }
 0x203   : > { %p16_p5 = scmp.ge.s32.totalorder %s19_s26, 4   ;;  %s976_s22 = smov %s787_s23 }
 0x204   : > { %s977_s23 = smov %s892_s10  ;;  %s978_s24 = smov %s795_s25 }
 0x205   : > { %s979_s25 = smov %s981_s29  ;;  %18 = sbr.rel (!%p16_p5) target bundleno = 4 (0x4), region = 82 }
 0x20c   :  { %553 = vsyncpa [#allocation3], 1 }
 0x20d   :  { %555 = vsyncpa [#allocation3 + $0x1], 1 }

</bundles_post_ra>
